<compile_context>
chip_gen: v6e
topology: v6e:2x2x1
jax: 0.10.0
libtpu: 0.0.40
codegen_flags: <defaults>
</compile_context>

<pallas_src>
import functools

import jax
import jax.numpy as jnp
from jax import lax
from jax.experimental import pallas as pl
from jax.experimental.pallas import tpu as pltpu


def homograph_kernel(z_ref, z2_ref, w_ref, b_ref,
                     matrix_ref, pi_ref, disp_ref, mean_ref):
    # Matrix tile: (TR, L) @ (C, L)^T -> (TR, C).  bf16 MXU inputs, f32 acc.
    matrix = lax.dot_general(
        z_ref[...], z2_ref[...],
        dimension_numbers=(((1,), (1,)), ((), ())),
        preferred_element_type=jnp.float32,
    )
    matrix_ref[...] = matrix            # Matrix is part of the module output.

    # One wide matmul for all three heads: (TR, C) @ (C, 3C) -> (TR, 3C).
    lin = jnp.dot(matrix.astype(jnp.bfloat16), w_ref[...],
                  preferred_element_type=jnp.float32) + b_ref[...]
    C = pi_ref.shape[-1]
    pi_lin = lin[:, :C]
    disp_lin = lin[:, C:2 * C]
    mean_lin = lin[:, 2 * C:]

    # sigmoid(x) == 0.5*tanh(0.5*x) + 0.5  -- single EUP op instead of exp+div.
    pi_ref[...] = 0.5 * jnp.tanh(0.5 * pi_lin) + 0.5
    # softplus + clamps, all elementwise math in f32.
    disp_ref[...] = jnp.clip(jnp.logaddexp(disp_lin, 0.0), 1e-4, 1e4)
    mean_ref[...] = jnp.clip(jnp.exp(mean_lin), 1e-5, 1e6)


def pack_params(params):
    """One-time packing of the 3 decoder Linears (do at init, not per call)."""
    w_cat = jnp.concatenate(
        [params["w_pi"].T, params["w_disp"].T, params["w_mean"].T], axis=1,
    ).astype(jnp.bfloat16)                                   # (C, 3C)
    b_cat = jnp.concatenate(
        [params["b_pi"], params["b_disp"], params["b_mean"]],
    ).astype(jnp.float32)[None, :]                           # (1, 3C)
    return {"w_cat": w_cat, "b_cat": b_cat}


@functools.partial(jax.jit, static_argnames=("tile_r",))
def homograph_forward(z_mean, z_mean2, w_cat, b_cat, *, tile_r=256):
    """Fused HomoGraph decoder head.  Returns (Matrix, pi, disp, mean)."""
    R, L = z_mean.shape
    C, L2 = z_mean2.shape
    assert L == L2 and w_cat.shape == (C, 3 * C) and b_cat.shape == (1, 3 * C)

    # Row tiling: round R up to a sublane multiple (8), then to a TR multiple.
    r8 = pl.cdiv(R, 8) * 8
    tr = min(tile_r, r8)
    r_pad = pl.cdiv(r8, tr) * tr

    z = z_mean.astype(jnp.bfloat16)
    if r_pad != R:
        z = jnp.pad(z, ((0, r_pad - R), (0, 0)))   # zero rows -> sliced off below
    z2 = z_mean2.astype(jnp.bfloat16)

    grid = (r_pad // tr,)
    out_shape = tuple(jax.ShapeDtypeStruct((r_pad, C), jnp.float32)
                      for _ in range(4))

    outs = pl.pallas_call(
        homograph_kernel,
        out_shape=out_shape,
        grid=grid,
        in_specs=[
            pl.BlockSpec((tr, L), lambda i: (i, 0)),        # z rows: tiled
            pl.BlockSpec((C, L), lambda i: (0, 0)),         # z2: VMEM-resident
            pl.BlockSpec((C, 3 * C), lambda i: (0, 0)),     # fused weights
            pl.BlockSpec((1, 3 * C), lambda i: (0, 0)),     # fused biases
        ],
        out_specs=tuple(pl.BlockSpec((tr, C), lambda i: (i, 0))
                        for _ in range(4)),
        compiler_params=pltpu.CompilerParams(
            dimension_semantics=("parallel",),     # shard row tiles across TCs (v7x)
            vmem_limit_bytes=48 * 1024 * 1024,     # headroom under v7x's 64 MiB
        ),
    )(z, z2, w_cat, b_cat)

    if r_pad != R:
        outs = tuple(o[:R] for o in outs)
    return outs


def _init_linear(key, in_dim, out_dim):
    # Deterministic torch.nn.Linear-style init: U(-1/sqrt(in), 1/sqrt(in)).
    kw, kb = jax.random.split(key)
    bound = 1.0 / jnp.sqrt(jnp.float32(in_dim))
    w = jax.random.uniform(kw, (out_dim, in_dim), jnp.float32, -bound, bound)
    b = jax.random.uniform(kb, (out_dim,), jnp.float32, -bound, bound)
    return w, b


def _reference(z_mean, z_mean2, params):
    # Pure-JAX reference mirroring the kernel's bf16 MXU-input casts.
    z = z_mean.astype(jnp.bfloat16)
    z2 = z_mean2.astype(jnp.bfloat16)
    matrix = jnp.dot(z, z2.T, preferred_element_type=jnp.float32)
    m_bf = matrix.astype(jnp.bfloat16)

    def head(w, b):
        return jnp.dot(m_bf, w.T.astype(jnp.bfloat16),
                       preferred_element_type=jnp.float32) + b

    pi = jax.nn.sigmoid(head(params["w_pi"], params["b_pi"]))
    disp = jnp.clip(jax.nn.softplus(head(params["w_disp"], params["b_disp"])),
                    1e-4, 1e4)
    mean = jnp.clip(jnp.exp(head(params["w_mean"], params["b_mean"])),
                    1e-5, 1e6)
    return matrix, pi, disp, mean


if __name__ == "__main__":
    key = jax.random.PRNGKey(0)
    k_z, k_z2, k_pi, k_disp, k_mean = jax.random.split(key, 5)

    # Shapes consistent with the module: latent_dim=15, cell_dim=128.
    latent_dim = 15
    cell_dim = 128

    w_pi, b_pi = _init_linear(k_pi, cell_dim, cell_dim)
    w_disp, b_disp = _init_linear(k_disp, cell_dim, cell_dim)
    w_mean, b_mean = _init_linear(k_mean, cell_dim, cell_dim)
    params = dict(w_pi=w_pi, b_pi=b_pi,
                  w_disp=w_disp, b_disp=b_disp,
                  w_mean=w_mean, b_mean=b_mean)

    packed = pack_params(params)   # done once at "init" time, not per call

    # Small demo (single tile) + a multi-tile case that exercises row padding.
    for n_rows in (16, 300):
        kz = jax.random.fold_in(k_z, n_rows)
        kz2 = jax.random.fold_in(k_z2, n_rows)
        z_mean = jax.random.normal(kz, (n_rows, latent_dim), jnp.float32)
        z_mean2 = jax.random.normal(kz2, (cell_dim, latent_dim), jnp.float32)

        outs = jax.block_until_ready(
            homograph_forward(z_mean, z_mean2,
                              packed["w_cat"], packed["b_cat"]))
        ref = _reference(z_mean, z_mean2, params)
        for got, want in zip(outs, ref):
            assert got.shape == want.shape and got.dtype == jnp.float32
            assert jnp.allclose(got, want, rtol=2e-3, atol=2e-3), (
                "max abs err = %f" % float(jnp.max(jnp.abs(got - want))))

    print("KERNEL_OK")
</pallas_src>

<mosaic_0001>
module attributes {stable_mosaic.version = 11 : i64} {
  func.func @homograph_kernel(%arg0: i32, %arg1: memref<16x15xbf16, #tpu.memory_space<vmem>>, %arg2: memref<128x15xbf16, #tpu.memory_space<vmem>>, %arg3: memref<128x384xbf16, #tpu.memory_space<vmem>>, %arg4: memref<1x384xf32, #tpu.memory_space<vmem>>, %arg5: memref<16x128xf32, #tpu.memory_space<vmem>>, %arg6: memref<16x128xf32, #tpu.memory_space<vmem>>, %arg7: memref<16x128xf32, #tpu.memory_space<vmem>>, %arg8: memref<16x128xf32, #tpu.memory_space<vmem>>) attributes {dimension_semantics = [#tpu.dimension_semantics<parallel>], iteration_bounds = array<i64: 1>, scalar_prefetch = 0 : i64, scratch_operands = 0 : i64, tpu.core_type = #tpu.core_type<tc>, window_params = [{transform_indices = @transform_0, window_bounds = array<i64: 16, 15>}, {pipeline_mode = #tpu.pipeline_mode<synchronous>, transform_indices = @transform_1, window_bounds = array<i64: 128, 15>}, {pipeline_mode = #tpu.pipeline_mode<synchronous>, transform_indices = @transform_2, window_bounds = array<i64: 128, 384>}, {pipeline_mode = #tpu.pipeline_mode<synchronous>, transform_indices = @transform_3, window_bounds = array<i64: 1, 384>}, {transform_indices = @transform_4, window_bounds = array<i64: 16, 128>}, {transform_indices = @transform_5, window_bounds = array<i64: 16, 128>}, {transform_indices = @transform_6, window_bounds = array<i64: 16, 128>}, {transform_indices = @transform_7, window_bounds = array<i64: 16, 128>}]} {
    %c0 = arith.constant 0 : index
    %c0_0 = arith.constant 0 : index
    %0 = vector.load %arg1[%c0, %c0_0] : memref<16x15xbf16, #tpu.memory_space<vmem>>, vector<16x15xbf16>
    %c0_1 = arith.constant 0 : index
    %c0_2 = arith.constant 0 : index
    %1 = vector.load %arg2[%c0_1, %c0_2] : memref<128x15xbf16, #tpu.memory_space<vmem>>, vector<128x15xbf16>
    %cst = arith.constant dense<0.000000e+00> : vector<16x128xf32>
    %2 = tpu.matmul %0, %1, %cst {dimension_numbers = #tpu.dot_dimension_numbers<[1], [1], [0], [0], [0, 0, 1, 0], [], []>} : vector<16x15xbf16>, vector<128x15xbf16>, vector<16x128xf32> -> vector<16x128xf32>
    %c0_3 = arith.constant 0 : index
    %c0_4 = arith.constant 0 : index
    %3 = vector.load %arg5[%c0_3, %c0_4] : memref<16x128xf32, #tpu.memory_space<vmem>>, vector<16x128xf32>
    tpu.vector_store %arg5[%c0_3, %c0_4], %2 {strides = array<i32>} : memref<16x128xf32, #tpu.memory_space<vmem>>, vector<16x128xf32>,
    %4 = arith.truncf %2 : vector<16x128xf32> to vector<16x128xbf16>
    %c0_5 = arith.constant 0 : index
    %c0_6 = arith.constant 0 : index
    %5 = vector.load %arg3[%c0_5, %c0_6] : memref<128x384xbf16, #tpu.memory_space<vmem>>, vector<128x384xbf16>
    %cst_7 = arith.constant dense<0.000000e+00> : vector<16x384xf32>
    %6 = tpu.matmul %4, %5, %cst_7 {dimension_numbers = #tpu.dot_dimension_numbers<[1], [0], [0], [1], [0, 0, 1, 1], [], []>} : vector<16x128xbf16>, vector<128x384xbf16>, vector<16x384xf32> -> vector<16x384xf32>
    %c0_8 = arith.constant 0 : index
    %c0_9 = arith.constant 0 : index
    %7 = vector.load %arg4[%c0_8, %c0_9] : memref<1x384xf32, #tpu.memory_space<vmem>>, vector<1x384xf32>
    %8 = vector.broadcast %7 : vector<1x384xf32> to vector<16x384xf32>
    %9 = arith.addf %6, %8 : vector<16x384xf32>
    %10 = vector.extract_strided_slice %9 {offsets = [0, 0], sizes = [16, 128], strides = [1, 1]} : vector<16x384xf32> to vector<16x128xf32>
    %11 = vector.extract_strided_slice %9 {offsets = [0, 128], sizes = [16, 128], strides = [1, 1]} : vector<16x384xf32> to vector<16x128xf32>
    %12 = vector.extract_strided_slice %9 {offsets = [0, 256], sizes = [16, 128], strides = [1, 1]} : vector<16x384xf32> to vector<16x128xf32>
    %cst_10 = arith.constant 5.000000e-01 : f32
    %13 = vector.broadcast %cst_10 : f32 to vector<16x128xf32>
    %14 = arith.mulf %13, %10 : vector<16x128xf32>
    %15 = math.tanh %14 : vector<16x128xf32>
    %cst_11 = arith.constant 5.000000e-01 : f32
    %16 = vector.broadcast %cst_11 : f32 to vector<16x128xf32>
    %17 = arith.mulf %16, %15 : vector<16x128xf32>
    %cst_12 = arith.constant 5.000000e-01 : f32
    %18 = vector.broadcast %cst_12 : f32 to vector<16x128xf32>
    %19 = arith.addf %17, %18 : vector<16x128xf32>
    %c0_13 = arith.constant 0 : index
    %c0_14 = arith.constant 0 : index
    %20 = vector.load %arg6[%c0_13, %c0_14] : memref<16x128xf32, #tpu.memory_space<vmem>>, vector<16x128xf32>
    tpu.vector_store %arg6[%c0_13, %c0_14], %19 {strides = array<i32>} : memref<16x128xf32, #tpu.memory_space<vmem>>, vector<16x128xf32>,
    %cst_15 = arith.constant 0.000000e+00 : f32
    %21 = vector.broadcast %cst_15 : f32 to vector<16x128xf32>
    %22 = arith.maximumf %11, %21 : vector<16x128xf32>
    %23 = vector.broadcast %cst_15 : f32 to vector<16x128xf32>
    %24 = arith.subf %11, %23 : vector<16x128xf32>
    %25 = arith.cmpf one, %24, %24 : vector<16x128xf32>
    %26 = vector.broadcast %cst_15 : f32 to vector<16x128xf32>
    %27 = arith.addf %11, %26 : vector<16x128xf32>
    %28 = math.absf %24 : vector<16x128xf32>
    %cst_16 = arith.constant 0.000000e+00 : f32
    %29 = vector.broadcast %cst_16 : f32 to vector<16x128xf32>
    %30 = arith.subf %29, %28 : vector<16x128xf32>
    %31 = math.exp %30 : vector<16x128xf32>
    %32 = math.log1p %31 : vector<16x128xf32>
    %33 = arith.addf %22, %32 : vector<16x128xf32>
    %34 = arith.select %25, %27, %33 : vector<16x128xi1>, vector<16x128xf32>
    %cst_17 = arith.constant 9.99999974E-5 : f32
    %cst_18 = arith.constant 1.000000e+04 : f32
    %35 = vector.broadcast %cst_17 : f32 to vector<16x128xf32>
    %36 = arith.maximumf %35, %34 : vector<16x128xf32>
    %37 = vector.broadcast %cst_18 : f32 to vector<16x128xf32>
    %38 = arith.minimumf %37, %36 : vector<16x128xf32>
    %c0_19 = arith.constant 0 : index
    %c0_20 = arith.constant 0 : index
    %39 = vector.load %arg7[%c0_19, %c0_20] : memref<16x128xf32, #tpu.memory_space<vmem>>, vector<16x128xf32>
    tpu.vector_store %arg7[%c0_19, %c0_20], %38 {strides = array<i32>} : memref<16x128xf32, #tpu.memory_space<vmem>>, vector<16x128xf32>,
    %40 = math.exp %12 : vector<16x128xf32>
    %cst_21 = arith.constant 9.99999974E-6 : f32
    %cst_22 = arith.constant 1.000000e+06 : f32
    %41 = vector.broadcast %cst_21 : f32 to vector<16x128xf32>
    %42 = arith.maximumf %41, %40 : vector<16x128xf32>
    %43 = vector.broadcast %cst_22 : f32 to vector<16x128xf32>
    %44 = arith.minimumf %43, %42 : vector<16x128xf32>
    %c0_23 = arith.constant 0 : index
    %c0_24 = arith.constant 0 : index
    %45 = vector.load %arg8[%c0_23, %c0_24] : memref<16x128xf32, #tpu.memory_space<vmem>>, vector<16x128xf32>
    tpu.vector_store %arg8[%c0_23, %c0_24], %44 {strides = array<i32>} : memref<16x128xf32, #tpu.memory_space<vmem>>, vector<16x128xf32>,
    return
  }
  func.func @transform_0(%arg0: i32) -> (i32, i32) {
    %c0_i32 = arith.constant 0 : i32
    %c0_i32_0 = arith.constant 0 : i32
    return %arg0, %c0_i32 : i32, i32
  }
  func.func @transform_1(%arg0: i32) -> (i32, i32) {
    %c0_i32 = arith.constant 0 : i32
    %c0_i32_0 = arith.constant 0 : i32
    %c0_i32_1 = arith.constant 0 : i32
    return %c0_i32, %c0_i32_0 : i32, i32
  }
  func.func @transform_2(%arg0: i32) -> (i32, i32) {
    %c0_i32 = arith.constant 0 : i32
    %c0_i32_0 = arith.constant 0 : i32
    %c0_i32_1 = arith.constant 0 : i32
    return %c0_i32, %c0_i32_0 : i32, i32
  }
  func.func @transform_3(%arg0: i32) -> (i32, i32) {
    %c0_i32 = arith.constant 0 : i32
    %c0_i32_0 = arith.constant 0 : i32
    %c0_i32_1 = arith.constant 0 : i32
    return %c0_i32, %c0_i32_0 : i32, i32
  }
  func.func @transform_4(%arg0: i32) -> (i32, i32) {
    %c0_i32 = arith.constant 0 : i32
    %c0_i32_0 = arith.constant 0 : i32
    return %arg0, %c0_i32 : i32, i32
  }
  func.func @transform_5(%arg0: i32) -> (i32, i32) {
    %c0_i32 = arith.constant 0 : i32
    %c0_i32_0 = arith.constant 0 : i32
    return %arg0, %c0_i32 : i32, i32
  }
  func.func @transform_6(%arg0: i32) -> (i32, i32) {
    %c0_i32 = arith.constant 0 : i32
    %c0_i32_0 = arith.constant 0 : i32
    return %arg0, %c0_i32 : i32, i32
  }
  func.func @transform_7(%arg0: i32) -> (i32, i32) {
    %c0_i32 = arith.constant 0 : i32
    %c0_i32_0 = arith.constant 0 : i32
    return %arg0, %c0_i32 : i32, i32
  }
}

</mosaic_0001>

<bundles_post_ra>
// kernel: homograph_forward.1
= control target key start
LH: loop header
LB: loop body
LE: loop exit
PB: predicated region body
PF: predicated region fallthrough
CT: control target
= control target key end

     0   :  { %13 = vsyncpa [#allocation3], 0  ;;  %s982_s0 = inlined_call_operand.vmem [shape: bf16[16,15], index: 0, kind: input, shape index: {}]   ;;  %s983_s1 = inlined_call_operand.vmem [shape: bf16[128,15], index: 1, kind: input, shape index: {}]   ;;  %s984_s2 = inlined_call_operand.hbm [shape: bf16[128,384], index: 2, kind: input, shape index: {}]   ;;  %s985_s3 = inlined_call_operand.vmem [shape: f32[1,384], index: 3, kind: input, shape index: {}]   ;;  %s986_s4 = inlined_call_operand.hbm [shape: f32[16,128], index: 4, kind: output, shape index: {0}]   ;;  %s987_s5 = inlined_call_operand.hbm [shape: f32[16,128], index: 5, kind: output, shape index: {1}]   ;;  %s988_s6 = inlined_call_operand.hbm [shape: f32[16,128], index: 6, kind: output, shape index: {2}]   ;;  %s989_s7 = inlined_call_operand.hbm [shape: f32[16,128], index: 7, kind: output, shape index: {3}]  }
   0x1   :  { %14 = vsyncpa [#allocation4], 0 }
   0x2   :  { %15 = vsyncpa [#allocation7], 0 }
   0x3   :  { %16 = vsyncpa [#allocation10], 0  ;;  %s830_s24 = smov [#allocation2]  }
   0x4   :  { %s26_s25 = sshll.u32 %s830_s24, 4  ;;  %s27_s25 = int_to_ptr.vmem [resolvable:$true] %s26_s25 }
   0x5   :  { %s730_s26 = scalar_lea.vmem %s27_s25, 3072  ;;  %p735_p1 = scmp.lt.s32.totalorder %s27_s25, %s27_s25 }
   0x6   :  { %p731_p0 = scmp.ne.s32.totalorder %s27_s25, %s730_s26  ;;  %p736_p2 = scmp.lt.s32.totalorder %s730_s26, %s730_s26 }
   0x8   :  { %p737_p3 = por %p736_p2, %p735_p1 }
   0xa   :  { %p738_p4 = pnand %p737_p3, %p731_p0 }
   0xc   :  { %741 = shalt.err (!%p738_p4)
}
   0xd   :  { %s831_s27 = smov 192   ;;  %s832_s28 = smov 12  }
   0xe   :  { %32 = dma.hbm_to_vmem [thread:$0]  %s984_s2, 3072, %s27_s25, [#allocation3], %s831_s27, %s831_s27, %s832_s28  }
   0xf   :  { %822 = dma.done.wait [#allocation3], 3072  }
  0x10   :  { %823 = vsyncadd [#allocation3], 4294964224  ;;  %v833_v0 = vmov 0.0   ;;  %vm834_vm0 = vmmov 0   ;;  %vm102_vm1 = vcmask 121856   ;;  %v665_v1 = vld [vmem:[%s983_s1 + $0x38] sm:$0xff]  }
  0x11   :  { %613 = vmatprep.subr.bf16.mxu0 %v833_v0  ;;  %629 = vmatprep.mubr.msk.bf16.mxu0 %vm834_vm0, %v833_v0  ;;  %v128_v2 = vsel %vm102_vm1, %v665_v1, 0  ;;  %v666_v3 = vld [vmem:[%s983_s1 + $0x30] sm:$0xff]   ;;  %v674_v5 = vld [vmem:[#allocation2 + $0xac] ss:$12 sps:$4 sm:$0xff]   ;;  %v680_v10 = vld [vmem:[#allocation2 + $0x7c] ss:$12 sps:$4 sm:$0xff]  }
  0x12   :  { %614 = vmatpush3.bf16.xpose.msra.mxu0 %v128_v2  ;;  %v125_v4 = vsel %vm102_vm1, %v666_v3, 0  ;;  %v676_v6 = vld [vmem:[#allocation2 + $0xa8] ss:$12 sps:$4 sm:$0xff]   ;;  %351 = vmatprep.subr.bf16.mxu1 %v674_v5  ;;  %v679_v9 = vld [vmem:[#allocation2 + $0x90] ss:$12 sps:$4 sm:$0xff]   ;;  %v668_v14 = vld [vmem:[%s983_s1 + $0x20] sm:$0xff]  }
  0x13   :  { %615 = vmatprep.subr.bf16.mxu0 %v833_v0  ;;  %v677_v7 = vld [vmem:[#allocation2 + $0x94] ss:$12 sps:$4 sm:$0xff]   ;;  %v667_v8 = vld [vmem:[%s983_s1 + $0x28] sm:$0xff]   ;;  %352 = vmatpush1.bf16.msra.mxu1 %v676_v6  ;;  %v682_v12 = vld [vmem:[#allocation2 + $0x78] ss:$12 sps:$4 sm:$0xff]   ;;  %v119_v17 = vsel %vm102_vm1, %v668_v14, 0 }
  0x14   :  { %353 = vmatprep.subr.bf16.mxu1 %v677_v7  ;;  %v122_v11 = vsel %vm102_vm1, %v667_v8, 0  ;;  %v683_v13 = vld [vmem:[#allocation2 + $0x64] ss:$12 sps:$4 sm:$0xff]   ;;  %v685_v15 = vld [vmem:[#allocation2 + $0x60] ss:$12 sps:$4 sm:$0xff]   ;;  %v669_v20 = vld [vmem:[%s983_s1 + $0x18] sm:$0xff]  }
  0x15   :  { %v686_v16 = vld [vmem:[#allocation2 + $0x4c] ss:$12 sps:$4 sm:$0xff]   ;;  %v688_v18 = vld [vmem:[#allocation2 + $0x48] ss:$12 sps:$4 sm:$0xff]   ;;  %v691_v21 = vld [vmem:[#allocation2 + $0x30] ss:$12 sps:$4 sm:$0xff]  }
  0x16   :  { %v689_v19 = vld [vmem:[#allocation2 + $0x34] ss:$12 sps:$4 sm:$0xff]   ;;  %v692_v22 = vld [vmem:[#allocation2 + $0x1c] ss:$12 sps:$4 sm:$0xff]   ;;  %v116_v23 = vsel %vm102_vm1, %v669_v20, 0  ;;  %v835_v34 = vmov 0  }
  0x17   :  { %354 = vmatpush1.bf16.msra.mxu1 %v679_v9  ;;  %v694_v24 = vld [vmem:[#allocation2 + $0x18] ss:$12 sps:$4 sm:$0xff]   ;;  %v670_v25 = vld [vmem:[%s983_s1 + $0x10] sm:$0xff]   ;;  %v671_v27 = vld [vmem:[%s983_s1 + $0x8] sm:$0xff]   ;;  %383 = vmatprep.mubr.bf16.mxu1 %v835_v34 }
  0x18   :  { %355 = vmatprep.subr.bf16.mxu1 %v680_v10  ;;  %v113_v26 = vsel %vm102_vm1, %v670_v25, 0  ;;  %v110_v28 = vsel %vm102_vm1, %v671_v27, 0  ;;  %v672_v29 = vld [vmem:[%s983_s1] sm:$0xff]   ;;  %v698_v38 = vld [vmem:[#allocation2 + $0xb0] ss:$12 sps:$4 sm:$0xff]  }
  0x19   :  { %v107_v30 = vsel %vm102_vm1, %v672_v29, 0  ;;  %v673_v31 = vld [vmem:[%s982_s0] sm:$0xff]   ;;  %v701_v43 = vld [vmem:[#allocation2 + $0x68] ss:$12 sps:$4 sm:$0xff]   ;;  %v702_v44 = vld [vmem:[#allocation2 + $0x50] ss:$12 sps:$4 sm:$0xff]  }
  0x1a   :  { %616 = vmatpush3.bf16.xpose.msra.mxu0 %v125_v4  ;;  %v695_v32 = vld [vmem:[#allocation2 + $0x4] ss:$12 sps:$4 sm:$0xff]   ;;  %v697_v33 = vld [vmem:[#allocation2] ss:$12 sps:$4 sm:$0xff]   ;;  %v705_v47 = vld [vmem:[#allocation2 + $0x8] ss:$12 sps:$4 sm:$0xff]  }
  0x1b   :  { %617 = vmatprep.subr.bf16.mxu0 %v833_v0  ;;  %356 = vmatpush1.bf16.msra.mxu1 %v682_v12  ;;  %v699_v41 = vld [vmem:[#allocation2 + $0x98] ss:$12 sps:$4 sm:$0xff]   ;;  %v700_v42 = vld [vmem:[#allocation2 + $0x80] ss:$12 sps:$4 sm:$0xff]   ;;  %s836_s0 = smov [#allocation5]  }
  0x1c   :  { %357 = vmatprep.subr.bf16.mxu1 %v683_v13  ;;  %v703_v45 = vld [vmem:[#allocation2 + $0x38] ss:$12 sps:$4 sm:$0xff]   ;;  %v704_v46 = vld [vmem:[#allocation2 + $0x20] ss:$12 sps:$4 sm:$0xff]   ;;  %s502_s1 = sshll.u32 %s836_s0, 4  ;;  %s503_s1 = int_to_ptr.vmem [resolvable:$true] %s502_s1 }
  0x1d   :  { %s742_s25 = scalar_lea.vmem %s503_s1, 256  ;;  %p747_p6 = scmp.lt.s32.totalorder %s503_s1, %s503_s1 }
  0x1e   :  { %p743_p5 = scmp.ne.s32.totalorder %s503_s1, %s742_s25  ;;  %p748_p7 = scmp.lt.s32.totalorder %s742_s25, %s742_s25 }
  0x1f   :  { %358 = vmatpush1.bf16.msra.mxu1 %v685_v15 }
  0x20   :  { %359 = vmatprep.subr.bf16.mxu1 %v686_v16  ;;  %p749_p8 = por %p748_p7, %p747_p6 }
  0x22   :  { %618 = vmatpush3.bf16.xpose.msra.mxu0 %v122_v11  ;;  %p750_p9 = pnand %p749_p8, %p743_p5 }
  0x23   :  { %619 = vmatprep.subr.bf16.mxu0 %v833_v0  ;;  %360 = vmatpush1.bf16.msra.mxu1 %v688_v18 }
  0x24   :  { %361 = vmatprep.subr.bf16.mxu1 %v689_v19 }
  0x27   :  { %362 = vmatpush1.bf16.msra.mxu1 %v691_v21 }
  0x28   :  { %363 = vmatprep.subr.bf16.mxu1 %v692_v22 }
  0x2a   :  { %620 = vmatpush3.bf16.xpose.msra.mxu0 %v119_v17 }
  0x2b   :  { %621 = vmatprep.subr.bf16.mxu0 %v833_v0  ;;  %364 = vmatpush1.bf16.msra.mxu1 %v694_v24 }
  0x2c   :  { %365 = vmatprep.subr.bf16.mxu1 %v695_v32 }
  0x2f   :  { %366 = vmatpush1.bf16.msra.mxu1 %v697_v33 }
  0x30   :  { %633 = vmatprep.subr.bf16.mxu1 %v833_v0 }
  0x32   :  { %622 = vmatpush3.bf16.xpose.msra.mxu0 %v116_v23 }
  0x33   :  { %623 = vmatprep.subr.bf16.mxu0 %v833_v0 }
  0x3a   :  { %624 = vmatpush3.bf16.xpose.msra.mxu0 %v113_v26 }
  0x3b   :  { %625 = vmatprep.subr.bf16.mxu0 %v833_v0 }
  0x42   :  { %626 = vmatpush3.bf16.xpose.msra.mxu0 %v110_v28 }
  0x43   :  { %627 = vmatprep.subr.bf16.mxu0 %v833_v0 }
  0x4a   :  { %628 = vmatpush3.bf16.xpose.msra.mxu0 %v107_v30 }
  0x51   :  { %630 = vmatmul.mubr.msk.bf16.vlgmr.msra.gmra.mxu0 %vm102_vm1, %v673_v31 }
 0x111   :  { %v164_v35 = vpop.f32.mrf.mxu0 }
 0x112   :  { %171 = vst [vmem:[#allocation5] sm:$0xff] %v164_v35 }
 0x113   :  { %v631_v36 = vpop.f32.mrf.mxu0 }
 0x115   :  { %v167_v37 = vpop.f32.mrf.mxu0 }
 0x116   :  { %172 = vst [vmem:[#allocation5 + $0x8] sm:$0xff] %v167_v37  ;;  %v173_v39 = vpack.c.bf16 %v167_v37, %v164_v35 }
 0x117   :  { %v632_v40 = vpop.f32.mrf.mxu0 }
 0x118   :  { %384 = vmatmul.mubr.bf16.vlgmr.msra.gmra.mxu1 %v173_v39 }
 0x119   :  { %634 = vmatpush3.bf16.msra.mxu1 %v698_v38  ;;  %649 = vmatprep.mubr.msk.bf16.mxu1 %vm834_vm0, %v833_v0 }
 0x11a   :  { %635 = vmatprep.subr.bf16.mxu1 %v833_v0 }
 0x11d   :  { %636 = vmatpush3.bf16.msra.mxu1 %v699_v41 }
 0x11e   :  { %637 = vmatprep.subr.bf16.mxu1 %v833_v0 }
 0x121   :  { %638 = vmatpush3.bf16.msra.mxu1 %v700_v42 }
 0x122   :  { %639 = vmatprep.subr.bf16.mxu1 %v833_v0 }
 0x125   :  { %640 = vmatpush3.bf16.msra.mxu1 %v701_v43 }
 0x126   :  { %641 = vmatprep.subr.bf16.mxu1 %v833_v0 }
 0x129   :  { %642 = vmatpush3.bf16.msra.mxu1 %v702_v44 }
 0x12a   :  { %643 = vmatprep.subr.bf16.mxu1 %v833_v0 }
 0x12d   :  { %644 = vmatpush3.bf16.msra.mxu1 %v703_v45 }
 0x12e   :  { %645 = vmatprep.subr.bf16.mxu1 %v833_v0 }
 0x131   :  { %646 = vmatpush3.bf16.msra.mxu1 %v704_v46 }
 0x132   :  { %647 = vmatprep.subr.bf16.mxu1 %v833_v0 }
 0x135   :  { %648 = vmatpush3.bf16.msra.mxu1 %v705_v47 }
 0x138   :  { %650 = vmatmul.mubr.bf16.vlgmr.msra.gmra.mxu1 %v173_v39 }
 0x139   :  { %753 = shalt.err (!%p750_p9)
}
 0x13a   :  { %s837_s26 = smov 128   ;;  %s838_s27 = smov 8   ;;  %v208_v48 = vlaneseq  ;;  %v206_v51 = vld [vmem:[%s985_s3] sm:$0x7] }
 0x13b   :  { %508 = dma.vmem_to_hbm [thread:$0]  %s503_s1, 256, %s986_s4, [#allocation4], %s837_s26, %s837_s26, %s838_s27  }
 0x13c   :  { %v209_v49 = vshrl.u32 %v208_v48, 7  ;;  %s839_s3 = smov [#allocation6]  }
 0x13d   :  { %s514_s4 = sshll.u32 %s839_s3, 4  ;;  %s515_s4 = int_to_ptr.vmem [resolvable:$true] %s514_s4 }
 0x13e   :  { %v210_v50 = vsub.s32 0, %v209_v49  ;;  %v214_v52 = vsub.s32 1, %v209_v49  ;;  %v218_v14 = vsub.s32 2, %v209_v49  ;;  %s762_s9 = scalar_lea.vmem %s515_s4, 256  ;;  %p767_p11 = scmp.lt.s32.totalorder %s515_s4, %s515_s4 }
 0x13f   :  { %p763_p10 = scmp.ne.s32.totalorder %s515_s4, %s762_s9  ;;  %p768_p12 = scmp.lt.s32.totalorder %s762_s9, %s762_s9 }
 0x140   :  { %v211_v53 = vrot.slane %v206_v51, %v210_v50  ;;  %v215_v54 = vrot.slane %v206_v51, %v214_v52  ;;  %v219_v18 = vrot.slane %v206_v51, %v218_v14 }
 0x141   :  { %p769_p13 = por %p768_p12, %p767_p11 }
 0x143   :  { %p770_p0 = pnand %p769_p13, %p763_p10 }
 0x1d8   :  { %v385_v55 = vpop.f32.mrf.mxu1 }
 0x1d9   :  { %v386_v56 = vadd.f32 %v385_v55, %v211_v53 }
 0x1da   :  { %v387_v57 = vpop.f32.mrf.mxu1 }
 0x1db   :  { %v435_v58 = vmul.f32 0.5, %v386_v56  ;;  %v950_v59 = vadd.f32 %v387_v57, %v215_v54 }
 0x1dc   :  { %v389_v60 = vpop.f32.mrf.mxu1 }
 0x1dd   :  { %706 = vtanh.f32 %v435_v58  ;;  %v451_v61 = vand.u32 2147483647, %v950_v59  ;;  %v390_v62 = vadd.f32 %v389_v60, %v211_v53 }
 0x1de   :  { %v391_v63 = vpop.f32.mrf.mxu1 }
 0x1df   :  { %v453_v0 = vsub.f32 0.0, %v451_v61  ;;  %v953_v1 = vadd.f32 %v391_v63, %v215_v54  ;;  %v436_v2 = vmul.f32 0.5, %v390_v62 }
 0x1e1   :  { %v455_v3 = vmul.f32 1.442695, %v453_v0  ;;  %v452_v4 = vand.u32 2147483647, %v953_v1  ;;  %708 = vtanh.f32 %v436_v2 }
 0x1e3   :  { %710 = vpow2.f32 %v455_v3  ;;  %v454_v5 = vsub.f32 0.0, %v452_v4 }
 0x1e5   :  { %v457_v6 = vmul.f32 1.442695, %v454_v5 }
 0x1e7   :  { %712 = vpow2.f32 %v457_v6 }
 0x1ea   :  { %v707_v7 = vpop.eup %706 }
 0x1eb   :  { %v439_v8 = vmul.f32 0.5, %v707_v7 }
 0x1ed   :  { %v441_v9 = vadd.f32 0.5, %v439_v8 }
 0x1ee   :  { %v709_v10 = vpop.eup %708 }
 0x1ef   :  { %443 = vst [vmem:[#allocation6] sm:$0xff] %v441_v9  ;;  %v440_v12 = vmul.f32 0.5, %v709_v10 }
 0x1f0   :  { %v711_v11 = vpop.eup %710 }
 0x1f1   :  { %v459_v13 = vadd.f32 1.0, %v711_v11  ;;  %v442_v15 = vadd.f32 0.5, %v440_v12 }
 0x1f3   :  { %714 = vlog2.f32 %v459_v13  ;;  %444 = vst [vmem:[#allocation6 + $0x8] sm:$0xff] %v442_v15 }
 0x1f4   :  { %v713_v16 = vpop.eup %712 }
 0x1f5   :  { %v468_v17 = vadd.f32 1.0, %v713_v16 }
 0x1f6   :  { %773 = shalt.err (!%p770_p0)
}
 0x1f7   :  { %520 = dma.vmem_to_hbm [thread:$0]  %s515_s4, 256, %s987_s5, [#allocation7], %s837_s26, %s837_s26, %s838_s27   ;;  %716 = vlog2.f32 %v468_v17  ;;  %v462_v20 = vmul.f32 -0.5, %v711_v11  ;;  %v471_v26 = vmul.f32 -0.5, %v713_v16  ;;  %v465_v28 = vand.u32 2147483647, %v711_v11 }
 0x1f8   :  { %v428_v19 = vpop.f32.mrf.mxu1  ;;  %v445_v35 = vmax.f32 %v950_v59, 0.0  ;;  %v474_v36 = vand.u32 2147483647, %v713_v16  ;;  %vm447_vm3 = vcmp.ne.f32.partialorder %v950_v59, %v950_v59  ;;  %v446_v43 = vmax.f32 %v953_v1, 0.0  ;;  %s840_s5 = smov [#allocation8]   ;;  %s841_s12 = smov [#allocation9]  }
 0x1f9   :  { %v429_v21 = vadd.f32 %v428_v19, %v219_v18  ;;  %v463_v25 = vadd.f32 1.0, %v462_v20  ;;  %v472_v34 = vadd.f32 1.0, %v471_v26  ;;  %vm466_vm2 = vcmp.lt.f32.partialorder %v465_v28, 0.0004427343  ;;  %s526_s11 = sshll.u32 %s840_s5, 4  ;;  %s538_s13 = sshll.u32 %s841_s12, 4  ;;  %s527_s11 = int_to_ptr.vmem [resolvable:$true] %s526_s11  ;;  %s539_s13 = int_to_ptr.vmem [resolvable:$true] %s538_s13 }
 0x1fa   :  { %v651_v22 = vpop.f32.mrf.mxu1  ;;  %vm475_vm4 = vcmp.lt.f32.partialorder %v474_v36, 0.0004427343  ;;  %vm448_vm5 = vcmp.ne.f32.partialorder %v953_v1, %v953_v1  ;;  %s782_s14 = scalar_lea.vmem %s527_s11, 256  ;;  %p787_p2 = scmp.lt.s32.totalorder %s527_s11, %s527_s11 }
 0x1fb   :  { %v487_v23 = vmul.f32 1.442695, %v429_v21  ;;  %v464_v33 = vmul.f32 %v711_v11, %v463_v25  ;;  %v473_v41 = vmul.f32 %v713_v16, %v472_v34  ;;  %p783_p1 = scmp.ne.s32.totalorder %s527_s11, %s782_s14  ;;  %p788_p3 = scmp.lt.s32.totalorder %s782_s14, %s782_s14 }
 0x1fc   :  { %v431_v24 = vpop.f32.mrf.mxu1 }
 0x1fd   :  { %718 = vpow2.f32 %v487_v23  ;;  %v432_v27 = vadd.f32 %v431_v24, %v219_v18  ;;  %p789_p4 = por %p788_p3, %p787_p2 }
 0x1fe   :  { %v652_v29 = vpop.f32.mrf.mxu1 }
 0x1ff   :  { %v489_v30 = vmul.f32 1.442695, %v432_v27  ;;  %p790_p5 = pnand %p789_p4, %p783_p1 }
 0x200   :  { %v715_v31 = vpop.eup %714 }
 0x201   :  { %v461_v32 = vmul.f32 0.6931472, %v715_v31  ;;  %720 = vpow2.f32 %v489_v30 }
 0x203   :  { %v467_v37 = vsel %vm466_vm2, %v464_v33, %v461_v32 }
 0x204   :  { %v717_v38 = vpop.eup %716  ;;  %v477_v39 = vadd.f32 %v467_v37, %v445_v35 }
 0x205   :  { %v470_v40 = vmul.f32 0.6931472, %v717_v38 }
 0x206   :  { %v479_v42 = vsel %vm447_vm3, %v950_v59, %v477_v39 }
 0x207   :  { %v481_v44 = vmax.f32 %v479_v42, 0.0001  ;;  %v476_v45 = vsel %vm475_vm4, %v473_v41, %v470_v40 }
 0x208   :  { %v478_v46 = vadd.f32 %v476_v45, %v446_v43 }
 0x209   :  { %v483_v47 = vmin.f32 %v481_v44, 10000.0 }
 0x20a   :  { %v719_v48 = vpop.eup %718  ;;  %v480_v49 = vsel %vm448_vm5, %v953_v1, %v478_v46 }
 0x20b   :  { %485 = vst [vmem:[#allocation8] sm:$0xff] %v483_v47  ;;  %v482_v50 = vmax.f32 %v480_v49, 0.0001  ;;  %v491_v51 = vmax.f32 %v719_v48, 1e-05 }
 0x20d   :  { %v484_v52 = vmin.f32 %v482_v50, 10000.0  ;;  %v493_v53 = vmin.f32 %v491_v51, 1000000.0 }
 0x20e   :  { %v721_v54 = vpop.eup %720 }
 0x20f   :  { %486 = vst [vmem:[#allocation8 + $0x8] sm:$0xff] %v484_v52  ;;  %495 = vst [vmem:[#allocation9] sm:$0xff] %v493_v53  ;;  %v492_v55 = vmax.f32 %v721_v54, 1e-05 }
 0x210   :  { %793 = shalt.err (!%p790_p5)
}
 0x211   :  { %532 = dma.vmem_to_hbm [thread:$0]  %s527_s11, 256, %s988_s6, [#allocation7], %s837_s26, %s837_s26, %s838_s27   ;;  %v494_v56 = vmin.f32 %v492_v55, 1000000.0 }
 0x212   :  { %s802_s17 = scalar_lea.vmem %s539_s13, 256  ;;  %p807_p7 = scmp.lt.s32.totalorder %s539_s13, %s539_s13 }
 0x213   :  { %496 = vst [vmem:[#allocation9 + $0x8] sm:$0xff] %v494_v56  ;;  %p803_p6 = scmp.ne.s32.totalorder %s539_s13, %s802_s17  ;;  %p808_p8 = scmp.lt.s32.totalorder %s802_s17, %s802_s17 }
 0x215   :  { %p809_p9 = por %p808_p8, %p807_p7 }
 0x217   :  { %p810_p10 = pnand %p809_p9, %p803_p6 }
 0x219   :  { %813 = shalt.err (!%p810_p10)
}
 0x21a   :  { %544 = dma.vmem_to_hbm [thread:$0]  %s539_s13, 256, %s989_s7, [#allocation10], %s837_s26, %s837_s26, %s838_s27  }
 0x21b   :  { %824 = dma.done.wait [#allocation4], 256  }
 0x21c   :  { %825 = vsyncadd [#allocation4], 4294967040 }
 0x21d   :  { %826 = dma.done.wait [#allocation7], 512  }
 0x21e   :  { %827 = vsyncadd [#allocation7], 4294966784 }
 0x21f   :  { %828 = dma.done.wait [#allocation10], 256  }
 0x220   :  { %829 = vsyncadd [#allocation10], 4294967040 }
 0x221   :  { %557 = vsyncpa [#allocation3], 1 }
 0x222   :  { %558 = vsyncpa [#allocation4], 1 }
 0x223   :  { %559 = vsyncpa [#allocation7], 1 }
 0x224   :  { %560 = vsyncpa [#allocation10], 1 }

</bundles_post_ra>
